<compile_context>
chip_gen: v5e
topology: v5e:2x2
jax: 0.10.0
libtpu: 0.0.40
codegen_flags: <defaults>
</compile_context>

<pallas_src>
import functools

import jax
import jax.numpy as jnp
from jax import lax
from jax.experimental import pallas as pl
from jax.experimental.pallas import tpu as pltpu


def _round_up(x, m):
    return (x + m - 1) // m * m


def _conv_block_kernel(x_ref, w1_ref, s1_ref, b1_ref, w2_ref, s2_ref, b2_ref,
                       o_ref, h_ref, *, H, W):
    """One batch image per grid step, channel-major / lane-dense layout.

    x_ref : (1, C_in, Pp)    zero-padded image, spatial flattened row-major:
                             flat index p = i*(W+2) + j of the (H+2, W+2)
                             padded image; zero tail out to Pp.
    w1_ref: (C_mid, 9*C_in)  conv1 weights, column = tap*C_in + c_in, tap=kh*3+kw
    s1/b1 : (C_mid, 1)       folded bn1 scale / shift (conv bias included)
    w2_ref: (C_out, 9*C_mid) conv2 weights
    s2/b2 : (C_out, 1)       folded bn2 scale / shift
    o_ref : (1, C_out, Q)    Q = H*(W+2); column q <-> padded position q+W+3
    h_ref : (C_mid, Pp)      VMEM scratch: padded-flat intermediate h
    """
    Wp = W + 2
    Q = H * Wp
    C_mid = w1_ref.shape[0]
    Pp = h_ref.shape[1]
    base = Wp + 1  # flat padded position of output pixel (1, 1) <-> column q=0

    # Tap offsets in the flat padded layout, kh-major (matches weight packing).
    offs = [(kh - 1) * Wp + (kw - 1) for kh in range(3) for kw in range(3)]

    # ---- conv1: one fused-K matmul (K = 9*C_in), then bn1 + relu ------------
    patch1 = jnp.concatenate(
        [x_ref[0, :, base + d: base + d + Q] for d in offs], axis=0)
    acc1 = jnp.dot(w1_ref[...], patch1, preferred_element_type=jnp.float32)
    h = jnp.maximum(acc1 * s1_ref[...] + b1_ref[...], 0.0)      # (C_mid, Q)

    # Zero the columns that land on the left/right (and one bottom) halo of
    # the padded image so conv2 sees a properly zero-padded h.
    col = lax.broadcasted_iota(jnp.int32, (1, Q), 1)
    h = jnp.where(col % Wp < W, h, 0.0)

    # Stage padded h in VMEM.  Only the small head / tail halo ranges are
    # zeroed (every step -> correct under megacore grid splitting); the
    # interleaved halo columns were masked above.
    h_ref[:, :base] = jnp.zeros((C_mid, base), jnp.float32)
    h_ref[:, base + Q:] = jnp.zeros((C_mid, Pp - base - Q), jnp.float32)
    h_ref[:, base: base + Q] = h

    # ---- conv2: one fused-K matmul (K = 9*C_mid), bn2 + residual + relu -----
    patch2 = jnp.concatenate(
        [h_ref[:, base + d: base + d + Q] for d in offs], axis=0)
    acc2 = jnp.dot(w2_ref[...], patch2, preferred_element_type=jnp.float32)
    y = jnp.maximum(acc2 * s2_ref[...] + b2_ref[...]
                    + h_ref[:, base: base + Q], 0.0)
    o_ref[...] = y[None].astype(o_ref.dtype)                    # lane-dense store


@jax.jit
def conv_block_nested(x_nchw, w1, b1, g1, be1, m1, v1,
                      w2, b2, g2, be2, m2, v2):
    """Forward pass of ConvBlockNested (inference-mode BatchNorm).

    x_nchw: (N, C_in, H, W) f32
    w1: (C_mid, C_in, 3, 3), b1: (C_mid,)       conv1 weight / bias
    g1, be1, m1, v1: (C_mid,)                   bn1 gamma / beta / mean / var
    w2: (C_out, C_mid, 3, 3), b2: (C_out,)      conv2 weight / bias
    g2, be2, m2, v2: (C_out,)                   bn2 gamma / beta / mean / var
    returns (N, C_out, H, W) f32
    """
    N, C_in, H, W = x_nchw.shape
    C_mid = w1.shape[0]
    C_out = w2.shape[0]
    assert C_mid == C_out, "residual add in ConvBlockNested requires mid_ch == out_ch"

    eps = 1e-5
    scale1 = g1 / jnp.sqrt(v1 + eps)
    shift1 = be1 + (b1 - m1) * scale1
    scale2 = g2 / jnp.sqrt(v2 + eps)
    shift2 = be2 + (b2 - m2) * scale2

    Hp, Wp = H + 2, W + 2
    Q = H * Wp                               # kernel output columns per image
    Pp = _round_up(Q + 2 * Wp + 2, 128)      # flat padded spatial, lane-rounded

    # Stay in NCHW (no transposes): halo pad, flatten spatial, lane-pad tail.
    x_pad = jnp.pad(x_nchw, ((0, 0), (0, 0), (1, 1), (1, 1)))
    x_flat = x_pad.reshape(N, C_in, Hp * Wp)
    x_flat = jnp.pad(x_flat, ((0, 0), (0, 0), (0, Pp - Hp * Wp)))

    # Pack conv weights as single 2-D slabs, tap-major columns (tap = kh*3+kw).
    w1_p = jnp.transpose(w1, (0, 2, 3, 1)).reshape(C_mid, 9 * C_in)
    w2_p = jnp.transpose(w2, (0, 2, 3, 1)).reshape(C_out, 9 * C_mid)

    flops = 2 * N * Q * 9 * (C_in * C_mid + C_mid * C_out)
    bytes_accessed = 4 * (x_flat.size + w1_p.size + w2_p.size
                          + N * C_out * Q + 2 * (C_mid + C_out))

    kernel = functools.partial(_conv_block_kernel, H=H, W=W)

    y = pl.pallas_call(
        kernel,
        out_shape=jax.ShapeDtypeStruct((N, C_out, Q), jnp.float32),
        grid_spec=pltpu.PrefetchScalarGridSpec(
            num_scalar_prefetch=0,
            grid=(N,),
            in_specs=[
                pl.BlockSpec((1, C_in, Pp), lambda n: (n, 0, 0)),
                pl.BlockSpec((C_mid, 9 * C_in), lambda n: (0, 0)),
                pl.BlockSpec((C_mid, 1), lambda n: (0, 0)),
                pl.BlockSpec((C_mid, 1), lambda n: (0, 0)),
                pl.BlockSpec((C_out, 9 * C_mid), lambda n: (0, 0)),
                pl.BlockSpec((C_out, 1), lambda n: (0, 0)),
                pl.BlockSpec((C_out, 1), lambda n: (0, 0)),
            ],
            out_specs=pl.BlockSpec((1, C_out, Q), lambda n: (n, 0, 0)),
            scratch_shapes=[pltpu.VMEM((C_mid, Pp), jnp.float32)],
        ),
        compiler_params=pltpu.CompilerParams(
            dimension_semantics=("parallel",),
        ),
        cost_estimate=pl.CostEstimate(
            flops=flops, transcendentals=0, bytes_accessed=bytes_accessed),
    )(x_flat, w1_p, scale1[:, None], shift1[:, None],
      w2_p, scale2[:, None], shift2[:, None])

    # Columns are (output row, padded width Wp): free reshape + strip the
    # 2 halo columns per row.  Output stays NCHW.
    return y.reshape(N, C_out, H, Wp)[:, :, :, :W]


def _reference(x, w1, b1, g1, be1, m1, v1, w2, b2, g2, be2, m2, v2, eps=1e-5):
    """Independent reference: lax.conv + eval-mode BatchNorm."""
    def conv(x, w, b):
        y = lax.conv_general_dilated(
            x, w, window_strides=(1, 1), padding=((1, 1), (1, 1)),
            dimension_numbers=("NCHW", "OIHW", "NCHW"))
        return y + b[None, :, None, None]

    def bn(x, g, be, m, v):
        return (g[None, :, None, None] * (x - m[None, :, None, None])
                / jnp.sqrt(v[None, :, None, None] + eps)
                + be[None, :, None, None])

    h = jax.nn.relu(bn(conv(x, w1, b1), g1, be1, m1, v1))
    return jax.nn.relu(bn(conv(h, w2, b2), g2, be2, m2, v2) + h)


if __name__ == "__main__":
    # Small shapes consistent with the module: batch=2, in_ch=4, mid=out=8, 16x16.
    N, C_in, C_mid, C_out, H, W = 2, 4, 8, 8, 16, 16

    key = jax.random.PRNGKey(0)
    ks = jax.random.split(key, 13)
    x = jax.random.normal(ks[0], (N, C_in, H, W), jnp.float32)

    w1 = jax.random.normal(ks[1], (C_mid, C_in, 3, 3), jnp.float32) * 0.2
    b1 = jax.random.normal(ks[2], (C_mid,), jnp.float32) * 0.1
    g1 = 1.0 + 0.1 * jax.random.normal(ks[3], (C_mid,), jnp.float32)
    be1 = 0.1 * jax.random.normal(ks[4], (C_mid,), jnp.float32)
    m1 = 0.1 * jax.random.normal(ks[5], (C_mid,), jnp.float32)
    v1 = 0.5 + jax.random.uniform(ks[6], (C_mid,), jnp.float32)

    w2 = jax.random.normal(ks[7], (C_out, C_mid, 3, 3), jnp.float32) * 0.2
    b2 = jax.random.normal(ks[8], (C_out,), jnp.float32) * 0.1
    g2 = 1.0 + 0.1 * jax.random.normal(ks[9], (C_out,), jnp.float32)
    be2 = 0.1 * jax.random.normal(ks[10], (C_out,), jnp.float32)
    m2 = 0.1 * jax.random.normal(ks[11], (C_out,), jnp.float32)
    v2 = 0.5 + jax.random.uniform(ks[12], (C_out,), jnp.float32)

    out = conv_block_nested(x, w1, b1, g1, be1, m1, v1,
                            w2, b2, g2, be2, m2, v2)
    out = jax.block_until_ready(out)
    assert out.shape == (N, C_out, H, W), out.shape

    ref = _reference(x, w1, b1, g1, be1, m1, v1, w2, b2, g2, be2, m2, v2)
    ref = jax.block_until_ready(ref)
    max_err = float(jnp.max(jnp.abs(out - ref)))
    assert jnp.allclose(out, ref, atol=1e-4, rtol=1e-4), max_err

    print("KERNEL_OK")
</pallas_src>

<mosaic_0001>
module attributes {stable_mosaic.version = 11 : i64} {
  func.func @_conv_block_kernel(%arg0: i32, %arg1: memref<1x4x384xf32, #tpu.memory_space<vmem>>, %arg2: memref<8x36xf32, #tpu.memory_space<vmem>>, %arg3: memref<8x1xf32, #tpu.memory_space<vmem>>, %arg4: memref<8x1xf32, #tpu.memory_space<vmem>>, %arg5: memref<8x72xf32, #tpu.memory_space<vmem>>, %arg6: memref<8x1xf32, #tpu.memory_space<vmem>>, %arg7: memref<8x1xf32, #tpu.memory_space<vmem>>, %arg8: memref<1x8x288xf32, #tpu.memory_space<vmem>>, %arg9: memref<8x384xf32, #tpu.memory_space<vmem>>) attributes {dimension_semantics = [#tpu.dimension_semantics<parallel>], iteration_bounds = array<i64: 2>, scalar_prefetch = 0 : i64, scratch_operands = 1 : i64, tpu.core_type = #tpu.core_type<tc>, window_params = [{transform_indices = @transform_0, window_bounds = array<i64: 1, 4, 384>}, {pipeline_mode = #tpu.pipeline_mode<synchronous>, transform_indices = @transform_1, window_bounds = array<i64: 8, 36>}, {pipeline_mode = #tpu.pipeline_mode<synchronous>, transform_indices = @transform_2, window_bounds = array<i64: 8, 1>}, {pipeline_mode = #tpu.pipeline_mode<synchronous>, transform_indices = @transform_3, window_bounds = array<i64: 8, 1>}, {pipeline_mode = #tpu.pipeline_mode<synchronous>, transform_indices = @transform_4, window_bounds = array<i64: 8, 72>}, {pipeline_mode = #tpu.pipeline_mode<synchronous>, transform_indices = @transform_5, window_bounds = array<i64: 8, 1>}, {pipeline_mode = #tpu.pipeline_mode<synchronous>, transform_indices = @transform_6, window_bounds = array<i64: 8, 1>}, {transform_indices = @transform_7, window_bounds = array<i64: 1, 8, 288>}]} {
    %c0 = arith.constant 0 : index
    %c0_0 = arith.constant 0 : index
    %c0_1 = arith.constant 0 : index
    %0 = vector.load %arg1[%c0, %c0_0, %c0_1] : memref<1x4x384xf32, #tpu.memory_space<vmem>>, vector<1x4x288xf32>
    %1 = vector.shape_cast %0 : vector<1x4x288xf32> to vector<4x288xf32>
    %c0_2 = arith.constant 0 : index
    %c0_3 = arith.constant 0 : index
    %c1 = arith.constant 1 : index
    %2 = vector.load %arg1[%c0_2, %c0_3, %c1] : memref<1x4x384xf32, #tpu.memory_space<vmem>>, vector<1x4x288xf32>
    %3 = vector.shape_cast %2 : vector<1x4x288xf32> to vector<4x288xf32>
    %c0_4 = arith.constant 0 : index
    %c0_5 = arith.constant 0 : index
    %c2 = arith.constant 2 : index
    %4 = vector.load %arg1[%c0_4, %c0_5, %c2] : memref<1x4x384xf32, #tpu.memory_space<vmem>>, vector<1x4x288xf32>
    %5 = vector.shape_cast %4 : vector<1x4x288xf32> to vector<4x288xf32>
    %c0_6 = arith.constant 0 : index
    %c0_7 = arith.constant 0 : index
    %c18 = arith.constant 18 : index
    %6 = vector.load %arg1[%c0_6, %c0_7, %c18] : memref<1x4x384xf32, #tpu.memory_space<vmem>>, vector<1x4x288xf32>
    %7 = vector.shape_cast %6 : vector<1x4x288xf32> to vector<4x288xf32>
    %c0_8 = arith.constant 0 : index
    %c0_9 = arith.constant 0 : index
    %c19 = arith.constant 19 : index
    %8 = vector.load %arg1[%c0_8, %c0_9, %c19] : memref<1x4x384xf32, #tpu.memory_space<vmem>>, vector<1x4x288xf32>
    %9 = vector.shape_cast %8 : vector<1x4x288xf32> to vector<4x288xf32>
    %c0_10 = arith.constant 0 : index
    %c0_11 = arith.constant 0 : index
    %c20 = arith.constant 20 : index
    %10 = vector.load %arg1[%c0_10, %c0_11, %c20] : memref<1x4x384xf32, #tpu.memory_space<vmem>>, vector<1x4x288xf32>
    %11 = vector.shape_cast %10 : vector<1x4x288xf32> to vector<4x288xf32>
    %c0_12 = arith.constant 0 : index
    %c0_13 = arith.constant 0 : index
    %c36 = arith.constant 36 : index
    %12 = vector.load %arg1[%c0_12, %c0_13, %c36] : memref<1x4x384xf32, #tpu.memory_space<vmem>>, vector<1x4x288xf32>
    %13 = vector.shape_cast %12 : vector<1x4x288xf32> to vector<4x288xf32>
    %c0_14 = arith.constant 0 : index
    %c0_15 = arith.constant 0 : index
    %c37 = arith.constant 37 : index
    %14 = vector.load %arg1[%c0_14, %c0_15, %c37] : memref<1x4x384xf32, #tpu.memory_space<vmem>>, vector<1x4x288xf32>
    %15 = vector.shape_cast %14 : vector<1x4x288xf32> to vector<4x288xf32>
    %c0_16 = arith.constant 0 : index
    %c0_17 = arith.constant 0 : index
    %c38 = arith.constant 38 : index
    %16 = vector.load %arg1[%c0_16, %c0_17, %c38] : memref<1x4x384xf32, #tpu.memory_space<vmem>>, vector<1x4x288xf32>
    %17 = vector.shape_cast %16 : vector<1x4x288xf32> to vector<4x288xf32>
    %18 = tpu.concatenate %1, %3, %5, %7, %9, %11, %13, %15, %17 in 0 : vector<4x288xf32>, vector<4x288xf32>, vector<4x288xf32>, vector<4x288xf32>, vector<4x288xf32>, vector<4x288xf32>, vector<4x288xf32>, vector<4x288xf32>, vector<4x288xf32> -> vector<36x288xf32>
    %c0_18 = arith.constant 0 : index
    %c0_19 = arith.constant 0 : index
    %19 = vector.load %arg2[%c0_18, %c0_19] : memref<8x36xf32, #tpu.memory_space<vmem>>, vector<8x36xf32>
    %cst = arith.constant dense<0.000000e+00> : vector<8x288xf32>
    %20 = tpu.matmul %19, %18, %cst {dimension_numbers = #tpu.dot_dimension_numbers<[1], [0], [0], [1], [0, 0, 1, 1], [], []>} : vector<8x36xf32>, vector<36x288xf32>, vector<8x288xf32> -> vector<8x288xf32>
    %c0_20 = arith.constant 0 : index
    %c0_21 = arith.constant 0 : index
    %21 = vector.load %arg3[%c0_20, %c0_21] : memref<8x1xf32, #tpu.memory_space<vmem>>, vector<8x1xf32>
    %22 = vector.broadcast %21 : vector<8x1xf32> to vector<8x288xf32>
    %23 = arith.mulf %20, %22 : vector<8x288xf32>
    %c0_22 = arith.constant 0 : index
    %c0_23 = arith.constant 0 : index
    %24 = vector.load %arg4[%c0_22, %c0_23] : memref<8x1xf32, #tpu.memory_space<vmem>>, vector<8x1xf32>
    %25 = vector.broadcast %24 : vector<8x1xf32> to vector<8x288xf32>
    %26 = arith.addf %23, %25 : vector<8x288xf32>
    %cst_24 = arith.constant 0.000000e+00 : f32
    %27 = vector.broadcast %cst_24 : f32 to vector<8x288xf32>
    %28 = arith.maximumf %26, %27 : vector<8x288xf32>
    %29 = tpu.iota {dimensions = array<i32: 1>} : vector<1x288xi32>
    %c18_i32 = arith.constant 18 : i32
    %c0_i32 = arith.constant 0 : i32
    %30 = arith.cmpi eq, %c18_i32, %c0_i32 : i32
    %c1_i32 = arith.constant 1 : i32
    %31 = arith.select %30, %c1_i32, %c18_i32 : i32
    %32 = vector.broadcast %31 : i32 to vector<1x288xi32>
    %33 = arith.remsi %29, %32 : vector<1x288xi32>
    %c0_i32_25 = arith.constant 0 : i32
    %34 = vector.broadcast %c0_i32_25 : i32 to vector<1x288xi32>
    %35 = arith.cmpi ne, %33, %34 : vector<1x288xi32>
    %c0_i32_26 = arith.constant 0 : i32
    %36 = vector.broadcast %c0_i32_26 : i32 to vector<1x288xi32>
    %37 = arith.cmpi slt, %33, %36 : vector<1x288xi32>
    %c0_i32_27 = arith.constant 0 : i32
    %38 = arith.cmpi slt, %31, %c0_i32_27 : i32
    %39 = vector.broadcast %38 : i1 to vector<1x288xi1>
    %40 = vector.broadcast %39 : vector<1x288xi1> to vector<1x288xi1>
    %41 = arith.xori %37, %40 : vector<1x288xi1>
    %42 = arith.andi %41, %35 : vector<1x288xi1>
    %43 = vector.broadcast %31 : i32 to vector<1x288xi32>
    %44 = arith.addi %33, %43 : vector<1x288xi32>
    %45 = arith.select %42, %44, %33 : vector<1x288xi1>, vector<1x288xi32>
    %c16_i32 = arith.constant 16 : i32
    %46 = vector.broadcast %c16_i32 : i32 to vector<1x288xi32>
    %47 = arith.cmpi slt, %45, %46 : vector<1x288xi32>
    %cst_28 = arith.constant 0.000000e+00 : f32
    %48 = vector.shape_cast %47 : vector<1x288xi1> to vector<1x288xi1>
    %49 = vector.broadcast %48 : vector<1x288xi1> to vector<8x288xi1>
    %50 = vector.broadcast %cst_28 : f32 to vector<8x288xf32>
    %51 = arith.select %49, %28, %50 : vector<8x288xi1>, vector<8x288xf32>
    %cst_29 = arith.constant 0.000000e+00 : f32
    %52 = vector.broadcast %cst_29 : f32 to vector<8x19xf32>
    %c0_30 = arith.constant 0 : index
    %c0_31 = arith.constant 0 : index
    %53 = vector.load %arg9[%c0_30, %c0_31] : memref<8x384xf32, #tpu.memory_space<vmem>>, vector<8x19xf32>
    tpu.vector_store %arg9[%c0_30, %c0_31], %52 {strides = array<i32>} : memref<8x384xf32, #tpu.memory_space<vmem>>, vector<8x19xf32>,
    %cst_32 = arith.constant 0.000000e+00 : f32
    %54 = vector.broadcast %cst_32 : f32 to vector<8x77xf32>
    %c0_33 = arith.constant 0 : index
    %c307 = arith.constant 307 : index
    %55 = vector.load %arg9[%c0_33, %c307] : memref<8x384xf32, #tpu.memory_space<vmem>>, vector<8x77xf32>
    tpu.vector_store %arg9[%c0_33, %c307], %54 {strides = array<i32>} : memref<8x384xf32, #tpu.memory_space<vmem>>, vector<8x77xf32>,
    %c0_34 = arith.constant 0 : index
    %c19_35 = arith.constant 19 : index
    %56 = vector.load %arg9[%c0_34, %c19_35] : memref<8x384xf32, #tpu.memory_space<vmem>>, vector<8x288xf32>
    tpu.vector_store %arg9[%c0_34, %c19_35], %51 {strides = array<i32>} : memref<8x384xf32, #tpu.memory_space<vmem>>, vector<8x288xf32>,
    %c0_36 = arith.constant 0 : index
    %c0_37 = arith.constant 0 : index
    %57 = vector.load %arg9[%c0_36, %c0_37] : memref<8x384xf32, #tpu.memory_space<vmem>>, vector<8x288xf32>
    %c0_38 = arith.constant 0 : index
    %c1_39 = arith.constant 1 : index
    %58 = vector.load %arg9[%c0_38, %c1_39] : memref<8x384xf32, #tpu.memory_space<vmem>>, vector<8x288xf32>
    %c0_40 = arith.constant 0 : index
    %c2_41 = arith.constant 2 : index
    %59 = vector.load %arg9[%c0_40, %c2_41] : memref<8x384xf32, #tpu.memory_space<vmem>>, vector<8x288xf32>
    %c0_42 = arith.constant 0 : index
    %c18_43 = arith.constant 18 : index
    %60 = vector.load %arg9[%c0_42, %c18_43] : memref<8x384xf32, #tpu.memory_space<vmem>>, vector<8x288xf32>
    %c0_44 = arith.constant 0 : index
    %c19_45 = arith.constant 19 : index
    %61 = vector.load %arg9[%c0_44, %c19_45] : memref<8x384xf32, #tpu.memory_space<vmem>>, vector<8x288xf32>
    %c0_46 = arith.constant 0 : index
    %c20_47 = arith.constant 20 : index
    %62 = vector.load %arg9[%c0_46, %c20_47] : memref<8x384xf32, #tpu.memory_space<vmem>>, vector<8x288xf32>
    %c0_48 = arith.constant 0 : index
    %c36_49 = arith.constant 36 : index
    %63 = vector.load %arg9[%c0_48, %c36_49] : memref<8x384xf32, #tpu.memory_space<vmem>>, vector<8x288xf32>
    %c0_50 = arith.constant 0 : index
    %c37_51 = arith.constant 37 : index
    %64 = vector.load %arg9[%c0_50, %c37_51] : memref<8x384xf32, #tpu.memory_space<vmem>>, vector<8x288xf32>
    %c0_52 = arith.constant 0 : index
    %c38_53 = arith.constant 38 : index
    %65 = vector.load %arg9[%c0_52, %c38_53] : memref<8x384xf32, #tpu.memory_space<vmem>>, vector<8x288xf32>
    %66 = tpu.concatenate %57, %58, %59, %60, %61, %62, %63, %64, %65 in 0 : vector<8x288xf32>, vector<8x288xf32>, vector<8x288xf32>, vector<8x288xf32>, vector<8x288xf32>, vector<8x288xf32>, vector<8x288xf32>, vector<8x288xf32>, vector<8x288xf32> -> vector<72x288xf32>
    %c0_54 = arith.constant 0 : index
    %c0_55 = arith.constant 0 : index
    %67 = vector.load %arg5[%c0_54, %c0_55] : memref<8x72xf32, #tpu.memory_space<vmem>>, vector<8x72xf32>
    %cst_56 = arith.constant dense<0.000000e+00> : vector<8x288xf32>
    %68 = tpu.matmul %67, %66, %cst_56 {dimension_numbers = #tpu.dot_dimension_numbers<[1], [0], [0], [1], [0, 0, 1, 1], [], []>} : vector<8x72xf32>, vector<72x288xf32>, vector<8x288xf32> -> vector<8x288xf32>
    %c0_57 = arith.constant 0 : index
    %c0_58 = arith.constant 0 : index
    %69 = vector.load %arg6[%c0_57, %c0_58] : memref<8x1xf32, #tpu.memory_space<vmem>>, vector<8x1xf32>
    %70 = vector.broadcast %69 : vector<8x1xf32> to vector<8x288xf32>
    %71 = arith.mulf %68, %70 : vector<8x288xf32>
    %c0_59 = arith.constant 0 : index
    %c0_60 = arith.constant 0 : index
    %72 = vector.load %arg7[%c0_59, %c0_60] : memref<8x1xf32, #tpu.memory_space<vmem>>, vector<8x1xf32>
    %73 = vector.broadcast %72 : vector<8x1xf32> to vector<8x288xf32>
    %74 = arith.addf %71, %73 : vector<8x288xf32>
    %c0_61 = arith.constant 0 : index
    %c19_62 = arith.constant 19 : index
    %75 = vector.load %arg9[%c0_61, %c19_62] : memref<8x384xf32, #tpu.memory_space<vmem>>, vector<8x288xf32>
    %76 = arith.addf %74, %75 : vector<8x288xf32>
    %cst_63 = arith.constant 0.000000e+00 : f32
    %77 = vector.broadcast %cst_63 : f32 to vector<8x288xf32>
    %78 = arith.maximumf %76, %77 : vector<8x288xf32>
    %79 = vector.shape_cast %78 : vector<8x288xf32> to vector<1x8x288xf32>
    %c0_64 = arith.constant 0 : index
    %c0_65 = arith.constant 0 : index
    %c0_66 = arith.constant 0 : index
    %80 = vector.load %arg8[%c0_64, %c0_65, %c0_66] : memref<1x8x288xf32, #tpu.memory_space<vmem>>, vector<1x8x288xf32>
    tpu.vector_store %arg8[%c0_64, %c0_65, %c0_66], %79 {strides = array<i32>} : memref<1x8x288xf32, #tpu.memory_space<vmem>>, vector<1x8x288xf32>,
    return
  }
  func.func @transform_0(%arg0: i32) -> (i32, i32, i32) {
    %c0_i32 = arith.constant 0 : i32
    %c0_i32_0 = arith.constant 0 : i32
    %c0_i32_1 = arith.constant 0 : i32
    return %arg0, %c0_i32, %c0_i32_0 : i32, i32, i32
  }
  func.func @transform_1(%arg0: i32) -> (i32, i32) {
    %c0_i32 = arith.constant 0 : i32
    %c0_i32_0 = arith.constant 0 : i32
    %c0_i32_1 = arith.constant 0 : i32
    return %c0_i32, %c0_i32_0 : i32, i32
  }
  func.func @transform_2(%arg0: i32) -> (i32, i32) {
    %c0_i32 = arith.constant 0 : i32
    %c0_i32_0 = arith.constant 0 : i32
    %c0_i32_1 = arith.constant 0 : i32
    return %c0_i32, %c0_i32_0 : i32, i32
  }
  func.func @transform_3(%arg0: i32) -> (i32, i32) {
    %c0_i32 = arith.constant 0 : i32
    %c0_i32_0 = arith.constant 0 : i32
    %c0_i32_1 = arith.constant 0 : i32
    return %c0_i32, %c0_i32_0 : i32, i32
  }
  func.func @transform_4(%arg0: i32) -> (i32, i32) {
    %c0_i32 = arith.constant 0 : i32
    %c0_i32_0 = arith.constant 0 : i32
    %c0_i32_1 = arith.constant 0 : i32
    return %c0_i32, %c0_i32_0 : i32, i32
  }
  func.func @transform_5(%arg0: i32) -> (i32, i32) {
    %c0_i32 = arith.constant 0 : i32
    %c0_i32_0 = arith.constant 0 : i32
    %c0_i32_1 = arith.constant 0 : i32
    return %c0_i32, %c0_i32_0 : i32, i32
  }
  func.func @transform_6(%arg0: i32) -> (i32, i32) {
    %c0_i32 = arith.constant 0 : i32
    %c0_i32_0 = arith.constant 0 : i32
    %c0_i32_1 = arith.constant 0 : i32
    return %c0_i32, %c0_i32_0 : i32, i32
  }
  func.func @transform_7(%arg0: i32) -> (i32, i32, i32) {
    %c0_i32 = arith.constant 0 : i32
    %c0_i32_0 = arith.constant 0 : i32
    %c0_i32_1 = arith.constant 0 : i32
    return %arg0, %c0_i32, %c0_i32_0 : i32, i32, i32
  }
}

</mosaic_0001>

<bundles_post_ra>
// kernel: conv_block_nested.1
= control target key start
LH: loop header
LB: loop body
LE: loop exit
PB: predicated region body
PF: predicated region fallthrough
CT: control target
= control target key end

     0   :  { %s1096_s24 = smov 0   ;;  %s1313_s0 = inlined_call_operand.vmem [shape: f32[2,4,384], index: 0, kind: input, shape index: {}]   ;;  %s1314_s1 = inlined_call_operand.vmem [shape: f32[8,36], index: 1, kind: input, shape index: {}]   ;;  %s1315_s2 = inlined_call_operand.vmem [shape: f32[8,1], index: 2, kind: input, shape index: {}]   ;;  %s1316_s3 = inlined_call_operand.vmem [shape: f32[8,1], index: 3, kind: input, shape index: {}]   ;;  %s1317_s4 = inlined_call_operand.vmem [shape: f32[8,72], index: 4, kind: input, shape index: {}]   ;;  %s1318_s5 = inlined_call_operand.vmem [shape: f32[8,1], index: 5, kind: input, shape index: {}]   ;;  %s1319_s6 = inlined_call_operand.vmem [shape: f32[8,1], index: 6, kind: input, shape index: {}]   ;;  %s1320_s7 = inlined_call_operand.vmem [shape: f32[2,8,288], index: 7, kind: output, shape index: {}]  }
   0x1 LB: > { %s925_s25 = sadd.s32 4294967295, %s1043_s24   ;;  %p929_p0 = scmp.ge.s32.totalorder %s1043_s24, 1  ;;  %s1043_s24 = sphi %s1096_s24, %s17_s24  }
   0x2   : > { %p237_p1 = scmp.lt.s32.totalorder %s1043_s24, 3 }
   0x4   : > { %p238_p2 = pnand %p929_p0, %p237_p1 }
   0x5   : > { %p269_p3 = scmp.lt.s32.totalorder (!%p238_p2), %s925_s25, 1  ;;  %s1045_s30 = smov (!%p238_p2), 127  }
   0x6   : > { %241 = sbr.rel (%p238_p2) target bundleno = 779 (0x30b), region = 48  ;;  %s1046_s8 = smov (!%p238_p2), 126  }
   0x7   : > { %s1047_s9 = smov (!%p238_p2), 110   ;;  %s1048_s10 = smov (!%p238_p2), 109  }
   0x8   : > { %s1049_s11 = smov (!%p238_p2), 108   ;;  %s1050_s12 = smov (!%p238_p2), 92  }
   0x9   : > { %s1051_s13 = smov (!%p238_p2), 91   ;;  %s1052_s14 = smov (!%p238_p2), 90  }
   0xa   : > { %s1054_s21 = smov (!%p238_p2), 19  }
   0xb   : > { %s1325_s25 = smov (!%p269_p3, %s925_s25), 1  ;;  %v530_v43 = vld [vmem:[%s1316_s3] sm:$0xff]  ;;  %v1053_v45 = vmov 0   ;;  %vm323_vm0 = vcmask 1031168   ;;  %vm416_vm1 = vcmask 744448   ;;  %vm434_vm2 = vcmask 736256  }
   0xc   : > { %s943_s26 = smul.u32 12, %s1325_s25  ;;  %v521_v44 = vld [vmem:[%s1315_s2] sm:$0xff]  ;;  %1000 = vset.pattern.permute.xlu0 %v1053_v45  ;;  %999 = vset.pattern.permute.xlu2 %v1053_v45  ;;  %vm397_vm3 = vcmask 752640   ;;  %vm379_vm4 = vcmask 883712   ;;  %vm360_vm5 = vcmask 891904   ;;  %vm437_vm6 = vcmask 1043456  }
   0xd   : > { %1036 = vset.pattern.permute.xlu1 %v1053_v45  ;;  %vm342_vm7 = vcmask 900096   ;;  %vm1321_vm8 = vcmask 1039360   ;;  %vm451_vm9 = vcmask 293888  }
   0xe   : > { %s273_s29 = scalar_lea.vmem %s1313_s0, %s943_s26 }
   0xf   : > { %v279_v0 = vld [vmem:[%s273_s29] sm:$0xff]  ;;  %v280_v1 = vld [vmem:[%s273_s29 + $0x8] sm:$0xf] }
  0x10   : > { %283 = vst [vmem:[#allocation1] ss:$2 sm:$0xff] %v279_v0 }
  0x11   : > { %285 = vst [vmem:[#allocation1 + $0x10] ss:$2 sm:$0xff] %v280_v1 }
  0x17   : > { %v1110_v2 = vld.sshfl [vmem:[#allocation1] sm:$0xff pattern:$0x75316420]  ;;  %v1112_v3 = vld.sshfl [vmem:[#allocation1 + $0x8] sm:$0xff pattern:$0x75316420] }
  0x18   : > { %293 = vst [vmem:[#allocation1 + $0x1] ss:$2 sm:$0xff] %v279_v0  ;;  %v1114_v4 = vld.sshfl [vmem:[#allocation1 + $0x10] sm:$0xff pattern:$0x75316420] }
  0x19   : > { %295 = vst [vmem:[#allocation1 + $0x11] ss:$2 sm:$0xff] %v280_v1 }
  0x1f   : > { %v296_v5 = vld.sshfl [vmem:[#allocation1] sm:$0xff pattern:$0x75316420]  ;;  %v297_v6 = vld.sshfl [vmem:[#allocation1 + $0x8] sm:$0xff pattern:$0x75316420] }
  0x20   : > { %v964_v7 = vpack.i.bf16 %v297_v6, %v296_v5  ;;  %311 = vst [vmem:[#allocation1] ss:$2 sm:$0xff] %v279_v0  ;;  %v1116_v8 = vld.sshfl [vmem:[#allocation1 + $0x10] sm:$0xff pattern:$0x75316420] }
  0x21   : > { %313 = vst [vmem:[#allocation1 + $0x10] ss:$2 sm:$0xff] %v280_v1 }
  0x22   : > { %965 = vrot.lane.b32.xlu2 %v964_v7, %s1045_s30 }
  0x27   : > { %v314_v9 = vld.sshfl [vmem:[#allocation1] sm:$0xff pattern:$0x75316420]  ;;  %v315_v10 = vld.sshfl [vmem:[#allocation1 + $0x8] sm:$0xff pattern:$0x75316420] }
  0x28   : > { %330 = vst [vmem:[#allocation1 + $0x1] ss:$2 sm:$0xff] %v279_v0  ;;  %v969_v11 = vpack.i.bf16 %v315_v10, %v314_v9  ;;  %v316_v12 = vld.sshfl [vmem:[#allocation1 + $0x10] sm:$0xff pattern:$0x75316420] }
  0x29   : > { %332 = vst [vmem:[#allocation1 + $0x11] ss:$2 sm:$0xff] %v280_v1 }
  0x2a   : > { %970 = vrot.lane.b32.xlu0 %v969_v11, %s1046_s8 }
  0x2f   : > { %v333_v13 = vld.sshfl [vmem:[#allocation1] sm:$0xff pattern:$0x75316420]  ;;  %v334_v14 = vld.sshfl [vmem:[#allocation1 + $0x8] sm:$0xff pattern:$0x75316420] }
  0x30   : > { %v974_v15 = vpack.i.bf16 %v334_v14, %v333_v13  ;;  %348 = vst [vmem:[#allocation1] ss:$2 sm:$0xff] %v279_v0  ;;  %v335_v16 = vld.sshfl [vmem:[#allocation1 + $0x10] sm:$0xff pattern:$0x75316420] }
  0x31   : > { %350 = vst [vmem:[#allocation1 + $0x10] ss:$2 sm:$0xff] %v280_v1 }
  0x32   : > { %975 = vrot.lane.b32.xlu1 %v974_v15, %s1047_s9 }
  0x37   : > { %v351_v17 = vld.sshfl [vmem:[#allocation1] sm:$0xff pattern:$0x75316420]  ;;  %v352_v18 = vld.sshfl [vmem:[#allocation1 + $0x8] sm:$0xff pattern:$0x75316420] }
  0x38   : > { %v979_v19 = vpack.i.bf16 %v352_v18, %v351_v17  ;;  %367 = vst [vmem:[#allocation1 + $0x1] ss:$2 sm:$0xff] %v279_v0  ;;  %v353_v20 = vld.sshfl [vmem:[#allocation1 + $0x10] sm:$0xff pattern:$0x75316420]  ;;  %v450_v17 = vld [vmem:[%s1314_s1] sm:$0xff] }
  0x39   : > { %369 = vst [vmem:[#allocation1 + $0x11] ss:$2 sm:$0xff] %v280_v1  ;;  %358 = vrot.lane.b32.xlu0 %v353_v20, %s1048_s10 }
  0x3a   : > { %980 = vrot.lane.b32.xlu2 %v979_v19, %s1048_s10 }
  0x3f   : > { %v370_v21 = vld.sshfl [vmem:[#allocation1] sm:$0xff pattern:$0x75316420]  ;;  %v371_v22 = vld.sshfl [vmem:[#allocation1 + $0x8] sm:$0xff pattern:$0x75316420] }
  0x40   : > { %385 = vst [vmem:[#allocation1] ss:$2 sm:$0xff] %v279_v0  ;;  %v372_v23 = vld.sshfl [vmem:[#allocation1 + $0x10] sm:$0xff pattern:$0x75316420]  ;;  %v984_v24 = vpack.i.bf16 %v371_v22, %v370_v21 }
  0x41   : > { %387 = vst [vmem:[#allocation1 + $0x10] ss:$2 sm:$0xff] %v280_v1 }
  0x42   : > { %985 = vrot.lane.b32.xlu2 %v984_v24, %s1049_s11 }
  0x47   : > { %v388_v25 = vld.sshfl [vmem:[#allocation1] sm:$0xff pattern:$0x75316420]  ;;  %v389_v26 = vld.sshfl [vmem:[#allocation1 + $0x8] sm:$0xff pattern:$0x75316420] }
  0x48   : > { %v989_v27 = vpack.i.bf16 %v389_v26, %v388_v25  ;;  %404 = vst [vmem:[#allocation1 + $0x1] ss:$2 sm:$0xff] %v279_v0  ;;  %v390_v28 = vld.sshfl [vmem:[#allocation1 + $0x10] sm:$0xff pattern:$0x75316420] }
  0x49   : > { %406 = vst [vmem:[#allocation1 + $0x11] ss:$2 sm:$0xff] %v280_v1 }
  0x4a   : > { %990 = vrot.lane.b32.xlu1 %v989_v27, %s1050_s12 }
  0x4f   : > { %v407_v29 = vld.sshfl [vmem:[#allocation1] sm:$0xff pattern:$0x75316420]  ;;  %v408_v30 = vld.sshfl [vmem:[#allocation1 + $0x8] sm:$0xff pattern:$0x75316420] }
  0x50   : > { %422 = vst [vmem:[#allocation1] ss:$2 sm:$0xff] %v279_v0  ;;  %v409_v31 = vld.sshfl [vmem:[#allocation1 + $0x10] sm:$0xff pattern:$0x75316420]  ;;  %v994_v32 = vpack.i.bf16 %v408_v30, %v407_v29 }
  0x51   : > { %424 = vst [vmem:[#allocation1 + $0x10] ss:$2 sm:$0xff] %v280_v1  ;;  %414 = vrot.lane.b32.xlu2 %v409_v31, %s1051_s13 }
  0x52   : > { %395 = vrot.lane.b32.xlu1 %v390_v28, %s1050_s12 }
  0x57   : > { %v425_v33 = vld.sshfl [vmem:[#allocation1] sm:$0xff pattern:$0x75316420]  ;;  %v426_v34 = vld.sshfl [vmem:[#allocation1 + $0x8] sm:$0xff pattern:$0x75316420] }
  0x58   : > { %428 = vrot.lane.b32.xlu0 %v425_v33, %s1052_s14  ;;  %v427_v35 = vld.sshfl [vmem:[#allocation1 + $0x10] sm:$0xff pattern:$0x75316420] }
  0x59   : > { %321 = vrot.lane.b32.xlu2 %v316_v12, %s1046_s8 }
  0x5a   : > { %995 = vrot.lane.b32.xlu1 %v994_v32, %s1051_s13 }
  0x60   : > { %430 = vrot.lane.b32.xlu0 %v426_v34, %s1052_s14 }
  0x61   : > { %524 = vperm.xlu2 %999, %v521_v44  }
  0x62   : > { %377 = vrot.lane.b32.xlu1 %v372_v23, %s1049_s11 }
  0x68   : > { %432 = vrot.lane.b32.xlu0 %v427_v35, %s1052_s14 }
  0x6a   : > { %303 = vrot.lane.b32.xlu1 %v1116_v8, %s1045_s30 }
  0x70   : > { %340 = vrot.lane.b32.xlu0 %v335_v16, %s1047_s9 }
  0x78   : > { %533 = vperm.xlu0 %1000, %v530_v43  }
  0x7c   : > { %v1140_v38 = vpop.permute.xlu2 %965 }
  0x7d   : > { %v968_v49 = vunpack.i.h.bf16 %v1140_v38  ;;  %v967_v1 = vunpack.i.l.bf16 %v1140_v38 }
  0x7f   : > { %v306_v14 = vsel %vm1321_vm8, %v967_v1, %v968_v49 }
  0x80   : > { %v438_v19 = vsel %vm437_vm6, %v1110_v2, %v306_v14 }
  0x94   : > { %v1146_v41 = vpop.permute.xlu2 %980 }
  0x95   : > { %v982_v52 = vunpack.i.l.bf16 %v1146_v41  ;;  %v983_v57 = vunpack.i.h.bf16 %v1146_v41 }
  0x97   : > { %v361_v6 = vsel %vm360_vm5, %v982_v52, %v983_v57 }
  0x9c   : > { %v1138_v37 = vpop.permute.xlu0 %970  ;;  %v986_v47 = vpop.permute.xlu2 %985 }
  0x9d   : > { %v988_v53 = vunpack.i.h.bf16 %v986_v47  ;;  %v987_v54 = vunpack.i.l.bf16 %v986_v47  ;;  %v973_v58 = vunpack.i.h.bf16 %v1138_v37  ;;  %v972_v61 = vunpack.i.l.bf16 %v1138_v37 }
  0x9e   : > { %v542_v37 = vlaneseq }
  0x9f   : > { %v380_v7 = vsel %vm379_vm4, %v987_v54, %v988_v53  ;;  %v324_v11 = vsel %vm323_vm0, %v972_v61, %v973_v58 }
  0xa0   : > { %v444_v13 = vsel %vm437_vm6, %v361_v6, %v380_v7  ;;  %v1217_v38 = vand.u32 127, %v542_v37 }
  0xa2   : > { %v1222_v41 = vadd.s32 128, %v1217_v38 }
  0xa4   : > { %v1136_v36 = vpop.permute.xlu1 %975 }
  0xa5   : > { %v978_v59 = vunpack.i.h.bf16 %v1136_v36  ;;  %v977_v60 = vunpack.i.l.bf16 %v1136_v36 }
  0xa7   : > { %v343_v12 = vsel %vm342_vm7, %v977_v60, %v978_v59 }
  0xa8   : > { %v441_v15 = vsel %vm437_vm6, %v324_v11, %v343_v12 }
  0xab   : > { %v1144_v40 = vpop.permute.xlu0 %358  ;;  %v415_v8 = vpop.permute.xlu2 %414 }
  0xac   : > { %v362_v24 = vsel %vm360_vm5, %v983_v57, %v1144_v40 }
  0xb3   : > { %v322_v2 = vpop.permute.xlu2 %321 }
  0xb4   : > { %v325_v29 = vsel %vm323_vm0, %v973_v58, %v322_v2 }
  0xbb   : > { %v525_v37 = vpop.permute.xlu2 %524 }
  0xbc   : > { %v1142_v39 = vpop.permute.xlu1 %990 }
  0xbd   : > { %v993_v55 = vunpack.i.h.bf16 %v1142_v39  ;;  %v992_v56 = vunpack.i.l.bf16 %v1142_v39  ;;  %v549_v39 = vand.u32 65535, %v1217_v38 }
  0xbf   : > { %v398_v5 = vsel %vm397_vm3, %v992_v56, %v993_v55  ;;  %v552_v43 = vmul.u32 14564, %v549_v39 }
  0xc4   : > { %v1148_v42 = vpop.permute.xlu1 %395 }
  0xc5   : > { %v399_v21 = vsel %vm397_vm3, %v993_v55, %v1148_v42  ;;  %v449_v25 = vsel %vm437_vm6, %v1148_v42, %v415_v8  ;;  %v578_v42 = vand.u32 65535, %v1222_v41 }
  0xc7   : > { %v582_v47 = vmul.u32 58254, %v578_v42  ;;  %v581_v52 = vmul.u32 14564, %v578_v42 }
  0xc9   : > { %v585_v54 = vshll.u32 %v582_v47, 16 }
  0xca   : > { %v429_v46 = vpop.permute.xlu0 %428 }
  0xcb   : > { %vm589_vm12 = vc.u32 %v581_v52, %v585_v54  ;;  %v591_v60 = vadd.s32 %v585_v54, %v581_v52 }
  0xcc   : > { %v996_v48 = vpop.permute.xlu1 %995  ;;  %v590_v6 = vsel %vm589_vm12, 1, %v1053_v45 }
  0xcd   : > { %v998_v50 = vunpack.i.h.bf16 %v996_v48  ;;  %v997_v51 = vunpack.i.l.bf16 %v996_v48  ;;  %v1227_v48 = vadd.s32 256, %v1217_v38 }
  0xcf   : > { %v417_v63 = vsel %vm416_vm1, %v997_v51, %v998_v50  ;;  %v418_v18 = vsel %vm416_vm1, %v998_v50, %v415_v8  ;;  %v608_v56 = vshrl.u32 %v1227_v48, 16 }
  0xd0   : > { %v447_v9 = vsel %vm437_vm6, %v398_v5, %v417_v63  ;;  %v448_v23 = vsel %vm437_vm6, %v399_v21, %v418_v18 }
  0xd1   : > { %v612_v63 = vmul.u32 14564, %v608_v56 }
  0xd2   : > { %v431_v62 = vpop.permute.xlu0 %430 }
  0xd3   : > { %v435_v0 = vsel %vm434_vm2, %v429_v46, %v431_v62  ;;  %v579_v46 = vshrl.u32 %v1222_v41, 16 }
  0xd4   : > { %932 = vmatpush.msk.msra.mxu2 %vm437_vm6, %v435_v0  ;;  %v378_v10 = vpop.permute.xlu1 %377 }
  0xd5   : > { %v381_v22 = vsel %vm379_vm4, %v988_v53, %v378_v10  ;;  %v446_v28 = vsel %vm437_vm6, %v1144_v40, %v378_v10  ;;  %v553_v40 = vmul.u32 58254, %v549_v39  ;;  %v583_v53 = vmul.u32 14564, %v579_v46 }
  0xd6   : > { %473 = vmatpush.msra.mxu2 %v447_v9  ;;  %v445_v26 = vsel %vm437_vm6, %v362_v24, %v381_v22  ;;  %v584_v5 = vmul.u32 58254, %v579_v46  ;;  %v616_v9 = vshll.u32 %v612_v63, 16 }
  0xd7   : > { %v556_v44 = vshll.u32 %v553_v40, 16  ;;  %v557_v7 = vshrl.u32 %v553_v40, 16  ;;  %v588_v22 = vshrl.u32 %v583_v53, 16 }
  0xd8   : > { %474 = vmatpush.msra.mxu2 %v444_v13  ;;  %v592_v11 = vadd.s32 %v590_v6, %v584_v5  ;;  %v613_v13 = vmul.u32 58254, %v608_v56 }
  0xd9   : > { %vm560_vm10 = vc.u32 %v552_v43, %v556_v44  ;;  %v562_v51 = vadd.s32 %v556_v44, %v552_v43 }
  0xda   : > { %475 = vmatpush.msra.mxu2 %v441_v15  ;;  %v433_v16 = vpop.permute.xlu0 %432  ;;  %v561_v58 = vsel %vm560_vm10, 1, %v1053_v45 }
  0xdb   : > { %v436_v20 = vsel %vm434_vm2, %v431_v62, %v433_v16 }
  0xdc   : > { %476 = vmatpush.msra.mxu2 %v438_v19  ;;  %934 = vmatpush.msk.msra.mxu1 %vm437_vm6, %v436_v20  ;;  %v304_v27 = vpop.permute.xlu1 %303 }
  0xdd   : > { %933 = vmatmul.msk.f32.vlgmr.msra.gmra.mxu2 %vm451_vm9, %v450_v17  ;;  %v307_v31 = vsel %vm1321_vm8, %v968_v49, %v304_v27  ;;  %v440_v34 = vsel %vm437_vm6, %v1114_v4, %v304_v27  ;;  %v550_v4 = vshrl.u32 %v1217_v38, 16  ;;  %v607_v49 = vand.u32 65535, %v1227_v48 }
  0xde   : > { %936 = vmatpush.msk.msrb.mxu2 %vm437_vm6, %v433_v16  ;;  %493 = vmatpush.msra.mxu1 %v448_v23  ;;  %v439_v36 = vsel %vm437_vm6, %v1112_v3, %v307_v31  ;;  %v617_v27 = vshrl.u32 %v612_v63, 16 }
  0xdf   : > { %v554_v3 = vmul.u32 14564, %v550_v4  ;;  %v555_v55 = vmul.u32 58254, %v550_v4  ;;  %v611_v57 = vmul.u32 58254, %v607_v49  ;;  %v610_v62 = vmul.u32 14564, %v607_v49 }
  0xe0   : > { %513 = vmatpush.msrb.mxu2 %v449_v25  ;;  %494 = vmatpush.msra.mxu1 %v445_v26 }
  0xe1   : > { %v558_v50 = vshll.u32 %v554_v3, 16  ;;  %v563_v61 = vadd.s32 %v561_v58, %v555_v55  ;;  %v614_v0 = vshll.u32 %v611_v57, 16  ;;  %v559_v15 = vshrl.u32 %v554_v3, 16 }
  0xe2   : > { %514 = vmatpush.msrb.mxu2 %v446_v28  ;;  %v341_v30 = vpop.permute.xlu0 %340  ;;  %v615_v24 = vshrl.u32 %v611_v57, 16 }
  0xe3   : > { %v344_v32 = vsel %vm342_vm7, %v978_v59, %v341_v30  ;;  %v443_v33 = vsel %vm437_vm6, %v322_v2, %v341_v30  ;;  %vm564_vm11 = vc.u32 %v562_v51, %v558_v50  ;;  %v587_v59 = vshll.u32 %v583_v53, 16 }
  0xe4   : > { %515 = vmatpush.msrb.mxu2 %v443_v33  ;;  %v442_v35 = vsel %vm437_vm6, %v325_v29, %v344_v32  ;;  %v565_v1 = vsel %vm564_vm11, 1, %v1053_v45  ;;  %vm618_vm14 = vc.u32 %v610_v62, %v614_v0  ;;  %v620_v10 = vadd.s32 %v614_v0, %v610_v62 }
  0xe5   : > { %495 = vmatpush.msra.mxu1 %v442_v35  ;;  %vm593_vm13 = vc.u32 %v591_v60, %v587_v59  ;;  %v567_v8 = vadd.s32 %v565_v1, %v563_v61  ;;  %v619_v14 = vsel %vm618_vm14, 1, %v1053_v45  ;;  %v1055_v59 = vmov 0.0  }
  0xe6   : > { %516 = vmatpush.msrb.mxu2 %v440_v34  ;;  %v594_v12 = vsel %vm593_vm13, 1, %v1053_v45  ;;  %vm622_vm15 = vc.u32 %v620_v10, %v616_v9  ;;  %v621_v19 = vadd.s32 %v619_v14, %v613_v13 }
  0xe7   : > { %496 = vmatpush.msra.mxu1 %v439_v36  ;;  %937 = vmatmul.msk.f32.vlgmr.msrb.gmra.mxu2 %vm451_vm9, %v450_v17  ;;  %v568_v16 = vadd.s32 %v567_v8, %v557_v7  ;;  %v596_v18 = vadd.s32 %v594_v12, %v592_v11  ;;  %v623_v20 = vsel %vm622_vm15, 1, %v1053_v45  ;;  %v851_v7 = vld [vmem:[%s1319_s6] sm:$0xff] }
  0xe8   : > { %935 = vmatmul.msk.f32.vlgmr.msra.gmra.mxu1 %vm451_vm9, %v450_v17  ;;  %v586_v17 = vshrl.u32 %v582_v47, 16  ;;  %v625_v2 = vadd.s32 %v623_v20, %v621_v19 }
  0xe9   : > { %v569_v21 = vadd.s32 %v568_v16, %v559_v15 }
  0xea   : > { %v597_v23 = vadd.s32 %v596_v18, %v586_v17  ;;  %v626_v28 = vadd.s32 %v625_v2, %v615_v24  ;;  %v534_v4 = vpop.permute.xlu0 %533  ;;  %v842_v2 = vld [vmem:[%s1318_s5] sm:$0xff] }
  0xeb   : > { %v570_v25 = vshrl.u32 %v569_v21, 4 }
  0xec   : > { %v598_v26 = vadd.s32 %v597_v23, %v588_v22  ;;  %v627_v31 = vadd.s32 %v626_v28, %v617_v27 }
  0xed   : > { %v571_v29 = vmul.u32 18, %v570_v25 }
  0xee   : > { %v599_v30 = vshrl.u32 %v598_v26, 4  ;;  %v628_v34 = vshrl.u32 %v627_v31, 4 }
  0xef   : > { %v572_v32 = vsub.s32 %v1217_v38, %v571_v29 }
  0xf0   : > { %v600_v33 = vmul.u32 18, %v599_v30  ;;  %v629_v36 = vmul.u32 18, %v628_v34 }
  0xf1   : > { %vm633_vm6 = vcmp.ne.s32.totalorder %v572_v32, 0  ;;  %vm636_vm9 = vcmp.lt.s32.totalorder %v572_v32, 0  ;;  %v642_v35 = vadd.s32 18, %v572_v32 }
  0xf2   : > { %v601_v45 = vsub.s32 %v1222_v41, %v600_v33  ;;  %vm639_vm10 = vmand %vm636_vm9, %vm633_vm6  ;;  %v630_v43 = vsub.s32 %v1227_v48, %v629_v36 }
  0xf3   : > { %v645_v42 = vsel %vm639_vm10, %v642_v35, %v572_v32 }
  0xf4   : > { %vm634_vm11 = vcmp.ne.s32.totalorder %v601_v45, 0  ;;  %vm637_vm12 = vcmp.lt.s32.totalorder %v601_v45, 0  ;;  %v643_v3 = vadd.s32 18, %v601_v45  ;;  %vm648_vm14 = vcmp.lt.s32.totalorder %v645_v42, 16  ;;  %v777_v42 = vld [vmem:[%s1317_s4] sm:$0xff] }
  0xf5   : > { %vm640_vm13 = vmand %vm637_vm12, %vm634_vm11  ;;  %vm635_vm15 = vcmp.ne.s32.totalorder %v630_v43, 0  ;;  %vm638_vm8 = vcmp.lt.s32.totalorder %v630_v43, 0  ;;  %v644_v50 = vadd.s32 18, %v630_v43  ;;  %vm660_vm11 = vcmask 154624  }
  0xf6   : > { %v646_v47 = vsel %vm640_vm13, %v643_v3, %v601_v45  ;;  %vm641_vm6 = vmand %vm638_vm8, %vm635_vm15  ;;  %vm662_vm12 = vcmask 1047960   ;;  %661 = vst.msk [vmem:[#allocation2] sm:$0xff] %vm660_vm11, %v1055_v59  ;;  %vm678_vm13 = vcmask 1047704   ;;  %vm681_vm8 = vcmask 416768  }
  0xf7   : > { %vm649_vm9 = vcmp.lt.s32.totalorder %v646_v47, 16  ;;  %v647_v54 = vsel %vm641_vm6, %v644_v50, %v630_v43  ;;  %663 = vst.msk [vmem:[#allocation2 + $0x10] sm:$0xff] %vm662_vm12, %v1055_v59  ;;  %vm778_vm15 = vcmask 588800  }
  0xf8   : > { %vm650_vm10 = vcmp.lt.s32.totalorder %v647_v54, 16 }
 0x160   : > { %v478_v39 = vpop.f32.mrf.mxu2 }
 0x161   : > { %v527_v40 = vmul.f32 %v525_v37, %v478_v39 }
 0x163   : > { %v536_v38 = vadd.f32 %v534_v4, %v527_v40 }
 0x165   : > { %v498_v44 = vpop.f32.mrf.mxu1  ;;  %v539_v46 = vmax.f32 %v536_v38, 0.0 }
 0x166   : > { %v528_v41 = vmul.f32 %v525_v37, %v498_v44 }
 0x167   : > { %v657_v49 = vsel %vm648_vm14, %v539_v46, 0.0  ;;  %vm1322_vm14 = vcmask 1039360  }
 0x168   : > { %v537_v51 = vadd.f32 %v534_v4, %v528_v41  ;;  %667 = vrot.lane.b32.xlu1 %v657_v49, %s1054_s21 }
 0x16a   : > { %v540_v52 = vmax.f32 %v537_v51, 0.0  ;;  %v518_v53 = vpop.f32.mrf.mxu2 }
 0x16b   : > { %v529_v48 = vmul.f32 %v525_v37, %v518_v53 }
 0x16c   : > { %v658_v55 = vsel %vm649_vm9, %v540_v52, 0.0 }
 0x16d   : > { %v538_v56 = vadd.f32 %v534_v4, %v529_v48  ;;  %669 = vrot.lane.b32.xlu2 %v658_v55, %s1054_s21 }
 0x16f   : > { %v541_v57 = vmax.f32 %v538_v56, 0.0 }
 0x171   : > { %v659_v58 = vsel %vm650_vm10, %v541_v57, 0.0 }
 0x172   : > { %671 = vrot.lane.b32.xlu1 %v659_v58, %s1054_s21 }
 0x1c7   : > { %v670_v60 = vpop.permute.xlu2 %669 }
 0x1da   : > { %v668_v61 = vpop.permute.xlu1 %667 }
 0x1db   : > { %v1240_v62 = vsel %vm660_vm11, %v668_v61, %v670_v60  ;;  %679 = vst.msk [vmem:[#allocation2] sm:$0xff] %vm678_vm13, %v668_v61 }
 0x1e2   : > { %v1242_v63 = vld [vmem:[#allocation2] sm:$0xff] }
 0x1e3   : > { %722 = vrot.lane.b32.xlu1 %v1242_v63, %s1048_s10  ;;  %v1006_v0 = vpack.i.bf16 %v1240_v62, %v1242_v63 }
 0x1e4   : > { %v672_v1 = vpop.permute.xlu1 %671 }
 0x1e5   : > { %v674_v5 = vsel %vm660_vm11, %v670_v60, %v672_v1  ;;  %1007 = vrot.lane.b32.xlu0 %v1006_v0, %s1051_s13  ;;  %1002 = vrot.lane.b32.xlu2 %v1006_v0, %s1052_s14 }
 0x1e6   : > { %682 = vst.msk [vmem:[#allocation2 + $0x10] sm:$0xff] %vm681_vm8, %v674_v5 }
 0x1eb   : > { %1012 = vrot.lane.b32.xlu1 %v1006_v0, %s1050_s12 }
 0x1ed   : > { %1027 = vrot.lane.b32.xlu0 %v1006_v0, %s1046_s8  ;;  %1017 = vrot.lane.b32.xlu2 %v1006_v0, %s1049_s11  ;;  %v1254_v6 = vld [vmem:[#allocation2 + $0x10] sm:$0xff] }
 0x1f3   : > { %1022 = vrot.lane.b32.xlu1 %v1006_v0, %s1047_s9 }
 0x1f5   : > { %724 = vrot.lane.b32.xlu2 %v1240_v62, %s1048_s10  ;;  %770 = vrot.lane.b32.xlu0 %v1254_v6, %s1052_s14 }
 0x1fb   : > { %737 = vrot.lane.b32.xlu1 %v1254_v6, %s1049_s11 }
 0x1fd   : > { %1032 = vrot.lane.b32.xlu2 %v1006_v0, %s1045_s30  ;;  %759 = vrot.lane.b32.xlu0 %v1254_v6, %s1051_s13 }
 0x203   : > { %715 = vrot.lane.b32.xlu1 %v1254_v6, %s1047_s9 }
 0x205   : > { %748 = vrot.lane.b32.xlu2 %v1254_v6, %s1050_s12  ;;  %726 = vrot.lane.b32.xlu0 %v1254_v6, %s1048_s10 }
 0x20b   : > { %845 = vperm.xlu1 %1036, %v842_v2  }
 0x20d   : > { %704 = vrot.lane.b32.xlu2 %v1254_v6, %s1046_s8  ;;  %693 = vrot.lane.b32.xlu0 %v1254_v6, %s1045_s30  ;;  %s944_s30 = smul.u32 24, %s1325_s25 }
 0x20f   : > { %s278_s10 = scalar_lea.vmem %s1320_s7, %s944_s30 }
 0x215   : > { %854 = vperm.xlu2 %999, %v851_v7  }
 0x23f   : > { %v1003_v8 = vpop.permute.xlu2 %1002 }
 0x240   : > { %v1005_v9 = vunpack.i.h.bf16 %v1003_v8  ;;  %v1004_v10 = vunpack.i.l.bf16 %v1003_v8 }
 0x242   : > { %v772_v11 = vsel %vm434_vm2, %v1004_v10, %v1005_v9 }
 0x243   : > { %789 = vmatpush.msra.mxu3 %v772_v11 }
 0x247   : > { %v1018_v12 = vpop.permute.xlu2 %1017 }
 0x248   : > { %v1020_v20 = vunpack.i.h.bf16 %v1018_v12  ;;  %v1019_v21 = vunpack.i.l.bf16 %v1018_v12 }
 0x24a   : > { %v739_v26 = vsel %vm379_vm4, %v1019_v21, %v1020_v20 }
 0x24f   : > { %v725_v18 = vpop.permute.xlu2 %724 }
 0x255   : > { %v723_v13 = vpop.permute.xlu1 %722 }
 0x256   : > { %v728_v27 = vsel %vm360_vm5, %v723_v13, %v725_v18 }
 0x257   : > { %v1008_v14 = vpop.permute.xlu0 %1007  ;;  %v1033_v28 = vpop.permute.xlu2 %1032 }
 0x258   : > { %v1010_v15 = vunpack.i.h.bf16 %v1008_v14  ;;  %v1009_v16 = vunpack.i.l.bf16 %v1008_v14  ;;  %v1035_v45 = vunpack.i.h.bf16 %v1033_v28  ;;  %v1034_v35 = vunpack.i.l.bf16 %v1033_v28 }
 0x25a   : > { %v761_v17 = vsel %vm416_vm1, %v1009_v16, %v1010_v15  ;;  %v695_v4 = vsel %vm1322_vm14, %v1034_v35, %v1035_v45 }
 0x25b   : > { %790 = vmatpush.msra.mxu3 %v761_v17 }
 0x25d   : > { %v1013_v19 = vpop.permute.xlu1 %1012 }
 0x25e   : > { %v1015_v22 = vunpack.i.h.bf16 %v1013_v19  ;;  %v1014_v23 = vunpack.i.l.bf16 %v1013_v19 }
 0x25f   : > { %v1028_v24 = vpop.permute.xlu0 %1027  ;;  %v749_v43 = vpop.permute.xlu2 %748 }
 0x260   : > { %v750_v25 = vsel %vm397_vm3, %v1014_v23, %v1015_v22  ;;  %v1030_v30 = vunpack.i.h.bf16 %v1028_v24  ;;  %v1029_v31 = vunpack.i.l.bf16 %v1028_v24  ;;  %v751_v44 = vsel %vm397_vm3, %v1015_v22, %v749_v43 }
 0x261   : > { %791 = vmatpush.msra.mxu3 %v750_v25 }
 0x262   : > { %v706_v39 = vsel %vm323_vm0, %v1029_v31, %v1030_v30 }
 0x263   : > { %792 = vmatpush.msra.mxu3 %v739_v26 }
 0x265   : > { %v1023_v29 = vpop.permute.xlu1 %1022  ;;  %793 = vmatpush.msra.mxu3 %v728_v27 }
 0x266   : > { %v1025_v32 = vunpack.i.h.bf16 %v1023_v29  ;;  %v1024_v33 = vunpack.i.l.bf16 %v1023_v29 }
 0x267   : > { %v771_v34 = vpop.permute.xlu0 %770  ;;  %v705_v50 = vpop.permute.xlu2 %704 }
 0x268   : > { %v717_v36 = vsel %vm342_vm7, %v1024_v33, %v1025_v32  ;;  %829 = vmatpush.msrb.mxu1 %v771_v34  ;;  %v773_v37 = vsel %vm434_vm2, %v1005_v9, %v771_v34  ;;  %v707_v52 = vsel %vm323_vm0, %v1030_v30, %v705_v50  ;;  %vm868_vm0 = vcmask 261120  }
 0x269   : > { %794 = vmatpush.msra.mxu3 %v717_v36  ;;  %809 = vmatpush.msra.mxu0 %v773_v37 }
 0x26b   : > { %795 = vmatpush.msra.mxu3 %v706_v39 }
 0x26d   : > { %v738_v40 = vpop.permute.xlu1 %737  ;;  %796 = vmatpush.msra.mxu3 %v695_v4 }
 0x26e   : > { %v740_v46 = vsel %vm379_vm4, %v1020_v20, %v738_v40 }
 0x26f   : > { %797 = vmatpush.msra.mxu3 %v1242_v63  ;;  %v760_v3 = vpop.permute.xlu0 %759  ;;  %v855_v57 = vpop.permute.xlu2 %854 }
 0x270   : > { %938 = vmatmul.msk.f32.vlgmr.msra.gmra.mxu3 %vm778_vm15, %v777_v42  ;;  %830 = vmatpush.msrb.mxu1 %v760_v3  ;;  %v762_v38 = vsel %vm416_vm1, %v1010_v15, %v760_v3  ;;  %vm1323_vm1 = vmmov %vm1322_vm14 }
 0x271   : > { %810 = vmatpush.msra.mxu0 %v762_v38 }
 0x272   : > { %831 = vmatpush.msrb.mxu1 %v749_v43 }
 0x273   : > { %811 = vmatpush.msra.mxu0 %v751_v44 }
 0x274   : > { %832 = vmatpush.msrb.mxu1 %v738_v40 }
 0x275   : > { %812 = vmatpush.msra.mxu0 %v740_v46  ;;  %v716_v41 = vpop.permute.xlu1 %715 }
 0x276   : > { %v718_v51 = vsel %vm342_vm7, %v1025_v32, %v716_v41 }
 0x277   : > { %v727_v47 = vpop.permute.xlu0 %726 }
 0x278   : > { %833 = vmatpush.msrb.mxu1 %v727_v47  ;;  %v729_v49 = vsel %vm360_vm5, %v725_v18, %v727_v47 }
 0x279   : > { %813 = vmatpush.msra.mxu0 %v729_v49 }
 0x27a   : > { %834 = vmatpush.msrb.mxu1 %v716_v41 }
 0x27b   : > { %814 = vmatpush.msra.mxu0 %v718_v51 }
 0x27c   : > { %835 = vmatpush.msrb.mxu1 %v705_v50 }
 0x27d   : > { %815 = vmatpush.msra.mxu0 %v707_v52  ;;  %v846_v54 = vpop.permute.xlu1 %845 }
 0x27f   : > { %v694_v53 = vpop.permute.xlu0 %693 }
 0x280   : > { %836 = vmatpush.msrb.mxu1 %v694_v53  ;;  %v696_v48 = vsel %vm1323_vm1, %v1035_v45, %v694_v53 }
 0x281   : > { %816 = vmatpush.msra.mxu0 %v696_v48 }
 0x282   : > { %837 = vmatpush.msrb.mxu1 %v1254_v6 }
 0x283   : > { %817 = vmatpush.msra.mxu0 %v1240_v62  ;;  %940 = vmatmul.msk.f32.vlgmr.msrb.gmra.mxu1 %vm778_vm15, %v777_v42 }
 0x284   : > { %939 = vmatmul.msk.f32.vlgmr.msra.gmra.mxu0 %vm778_vm15, %v777_v42 }
 0x2f3   : > { %v799_v55 = vpop.f32.mrf.mxu3 }
 0x2f4   : > { %v848_v56 = vmul.f32 %v846_v54, %v799_v55 }
 0x2f6   : > { %v857_v58 = vadd.f32 %v855_v57, %v848_v56 }
 0x2f8   : > { %v860_v59 = vadd.f32 %v857_v58, %v728_v27 }
 0x2fa   : > { %v863_v60 = vmax.f32 %v860_v59, 0.0 }
 0x2fc   : > { %866 = vst [vmem:[%s278_s10] sm:$0xff] %v863_v60 }
 0x300   : > { %v839_v61 = vpop.f32.mrf.mxu1 }
 0x301   : > { %v850_v63 = vmul.f32 %v846_v54, %v839_v61  ;;  %v819_v62 = vpop.f32.mrf.mxu0 }
 0x302   : > { %v849_v0 = vmul.f32 %v846_v54, %v819_v62 }
 0x303   : > { %v859_v1 = vadd.f32 %v855_v57, %v850_v63 }
 0x304   : > { %v858_v5 = vadd.f32 %v855_v57, %v849_v0 }
 0x305   : > { %v862_v6 = vadd.f32 %v859_v1, %v727_v47 }
 0x306   : > { %v861_v7 = vadd.f32 %v858_v5, %v729_v49 }
 0x307   : > { %v865_v8 = vmax.f32 %v862_v6, 0.0 }
 0x308   : > { %v864_v9 = vmax.f32 %v861_v7, 0.0 }
 0x309   : > { %869 = vst.msk [vmem:[%s278_s10 + $0x10] sm:$0xff] %vm868_vm0, %v865_v8 }
 0x30a   : > { %867 = vst [vmem:[%s278_s10 + $0x8] sm:$0xff] %v864_v9 }
 0x30b PF: > { %s17_s24 = sadd.s32 1, %s1043_s24  }
 0x30c   : > { %p14_p4 = scmp.ge.s32.totalorder %s17_s24, 4  }
 0x30e   :  { %16 = sbr.rel (!%p14_p4) target bundleno = 1 (0x1), region = 91 }

</bundles_post_ra>
